<compile_context>
chip_gen: v7x
topology: tpu7x:2x2x1
jax: 0.10.0
libtpu: 0.0.40
codegen_flags: <defaults>
</compile_context>

<pallas_src>
import math
import functools

import jax
import jax.numpy as jnp
from jax import lax
from jax.experimental import pallas as pl
from jax.experimental.pallas import tpu as pltpu

_NEG_INF = -1e30  # finite mask value -> running max / exp never see -inf - -inf


def _flash_head_kernel(x_q_ref, x_kv_ref, w_q_ref, b_q_ref, w_kv_ref, b_kv_ref,
                       o_ref, q_s, m_s, l_s, acc_s, *, scale):
    bb, T, C = x_q_ref.shape
    Tk = x_kv_ref.shape[1]
    Hp = q_s.shape[-1]

    kv_i = pl.program_id(1)

    @pl.when(kv_i == 0)
    def _init():
        # Q projection (once per batch tile); bf16 operands, f32 accumulation.
        xq = x_q_ref[...].astype(jnp.bfloat16).reshape(bb * T, C)
        q = jnp.dot(xq, w_q_ref[...], preferred_element_type=jnp.float32)
        q = (q + b_q_ref[...]) * scale                     # scale folded into q
        q_s[...] = q.astype(jnp.bfloat16).reshape(bb, T, Hp)
        m_s[...] = jnp.full_like(m_s, _NEG_INF)
        l_s[...] = jnp.zeros_like(l_s)
        acc_s[...] = jnp.zeros_like(acc_s)

    # K/V projection for the current KV tile (bf16 operands, f32 accumulation).
    xkv = x_kv_ref[...].astype(jnp.bfloat16).reshape(bb * Tk, C)
    kv = jnp.dot(xkv, w_kv_ref[...], preferred_element_type=jnp.float32)
    kv = (kv + b_kv_ref[...]).reshape(bb, Tk, 2 * Hp)
    k = kv[:, :, :Hp].astype(jnp.bfloat16)                 # 128-lane aligned slice
    v = kv[:, :, Hp:].astype(jnp.bfloat16)

    # scores[b, i, j] = sum_h q[b, i, h] * k[b, j, h]   (no explicit transpose)
    s = lax.dot_general(q_s[...], k,
                        dimension_numbers=(((2,), (2,)), ((0,), (0,))),
                        preferred_element_type=jnp.float32)        # (bb, T, Tk)

    # Causal mask with absolute KV column indices for this tile.
    row = lax.broadcasted_iota(jnp.int32, (T, Tk), 0)
    col = lax.broadcasted_iota(jnp.int32, (T, Tk), 1) + kv_i * Tk
    s = jnp.where((col <= row)[None, :, :], s, _NEG_INF)

    # Online-softmax update.
    m_new = jnp.maximum(m_s[...], jnp.max(s, axis=-1, keepdims=True))
    alpha = jnp.exp(m_s[...] - m_new)
    p = jnp.exp(s - m_new)
    l_s[...] = alpha * l_s[...] + jnp.sum(p, axis=-1, keepdims=True)
    acc_s[...] = alpha * acc_s[...] + lax.dot_general(
        p.astype(jnp.bfloat16), v,
        dimension_numbers=(((2,), (1,)), ((0,), (0,))),
        preferred_element_type=jnp.float32)
    m_s[...] = m_new

    @pl.when(kv_i == pl.num_programs(1) - 1)
    def _finalize():
        # approx reciprocal: probability rows sum to ~1 +/- 1e-3 (inference-ok).
        o_ref[...] = (acc_s[...] * pl.reciprocal(l_s[...], approx=True)
                      ).astype(o_ref.dtype)


def _device_vmem_and_cores():
    """Per-generation physical VMEM and TensorCore count (conservative fallback)."""
    kind = ""
    try:
        kind = jax.devices()[0].device_kind.lower()
    except Exception:
        pass
    if "v7" in kind:
        return 64 * 1024 * 1024, 2          # v7x: 64 MiB / TC, 2 TCs per chip
    if "v5" in kind or "v6" in kind:
        return 128 * 1024 * 1024, 1         # v5e / v6e: 128 MiB, 1 TC
    return 64 * 1024 * 1024, 1              # unknown: conservative


def _footprint_bytes(bb, T, Tk, C, Hp):
    """Approximate per-step VMEM footprint (double-buffered IO + scratch + temps)."""
    f32, bf16, db = 4, 2, 2
    io = db * (bb * T * C * f32                 # x (Q view)
               + bb * Tk * C * f32              # x (KV view)
               + C * Hp * bf16 + Hp * f32       # W_q, b_q
               + C * 2 * Hp * bf16 + 2 * Hp * f32   # W_kv, b_kv
               + bb * T * Hp * f32)             # output block
    scratch = bb * T * Hp * (bf16 + f32) + 2 * bb * T * f32
    temps = (bb * T * Tk * (f32 + f32 + bf16)       # scores, p, probs(bf16)
             + bb * Tk * 2 * Hp * (f32 + bf16)      # kv projection + k/v bf16
             + bb * T * Hp * f32)                   # q projection temp
    return io + scratch + temps


def _choose_tiling(B, T, C, Hp, budget_bytes, num_tc):
    """Largest batch tile (and then KV tile <= 512) that fits the VMEM budget.
    Only chips with 2 TensorCores (v7x) require >= 2 parallel grid steps."""
    kv_cands = sorted({d for d in range(8, T + 1, 8) if T % d == 0} | {T})
    kv_pref = sorted([t for t in kv_cands if t <= 512], reverse=True)
    if not kv_pref:
        kv_pref = [min(kv_cands)]
    bb_cands = sorted([d for d in range(1, B + 1) if B % d == 0], reverse=True)

    passes = [True, False] if (num_tc > 1 and B >= num_tc) else [False]
    for need_split in passes:
        for bb in bb_cands:
            if need_split and B // bb < num_tc:
                continue
            for tk in kv_pref:
                if _footprint_bytes(bb, T, tk, C, Hp) <= budget_bytes:
                    return bb, tk
    return 1, min(kv_cands)


def self_attention_head(x, wk, wq, wv, bk, bq, bv, *, head_size,
                        block_b=None, block_kv=None):
    """x: (B, T, C) float32; weights (C, H); biases (1, H). Returns (B, T, H)."""
    B, T, C = x.shape
    H = head_size
    Hp = ((H + 127) // 128) * 128            # lane-dense / 128-aligned head dim

    pad_cols = Hp - H
    pad_w = lambda w: jnp.pad(w, ((0, 0), (0, pad_cols)))
    pad_b = lambda b: jnp.pad(b, ((0, 0), (0, pad_cols)))

    # Zero-padded, pre-cast parameters.  K and V fused so the per-KV-tile
    # projection is a single MXU matmul; Q kept separate (projected once).
    w_q = pad_w(wq).astype(jnp.bfloat16)                       # (C, Hp)
    b_q = pad_b(bq).astype(jnp.float32)                        # (1, Hp)
    w_kv = jnp.concatenate([pad_w(wk), pad_w(wv)], axis=1).astype(jnp.bfloat16)
    b_kv = jnp.concatenate([pad_b(bk), pad_b(bv)], axis=1).astype(jnp.float32)

    phys_vmem, num_tc = _device_vmem_and_cores()
    budget = int(phys_vmem * 0.6)
    if block_b is None or block_kv is None:
        bb, tk = _choose_tiling(B, T, C, Hp, budget, num_tc)
        block_b = bb if block_b is None else block_b
        block_kv = tk if block_kv is None else block_kv
    assert B % block_b == 0 and T % block_kv == 0

    fp = _footprint_bytes(block_b, T, block_kv, C, Hp)
    vmem_limit = int(min(phys_vmem * 0.9, max(32 * 1024 * 1024, fp * 1.5)))

    kernel = functools.partial(_flash_head_kernel, scale=1.0 / math.sqrt(H))
    out_padded = pl.pallas_call(
        kernel,
        out_shape=jax.ShapeDtypeStruct((B, T, Hp), x.dtype),
        grid_spec=pltpu.PrefetchScalarGridSpec(
            num_scalar_prefetch=0,
            grid=(B // block_b, T // block_kv),       # (batch parallel, KV reduce)
            in_specs=[
                pl.BlockSpec((block_b, T, C), lambda b, k: (b, 0, 0)),        # x (Q)
                pl.BlockSpec((block_b, block_kv, C), lambda b, k: (b, k, 0)),  # x (KV)
                pl.BlockSpec((C, Hp), lambda b, k: (0, 0)),                    # W_q
                pl.BlockSpec((1, Hp), lambda b, k: (0, 0)),                    # b_q
                pl.BlockSpec((C, 2 * Hp), lambda b, k: (0, 0)),                # W_kv
                pl.BlockSpec((1, 2 * Hp), lambda b, k: (0, 0)),                # b_kv
            ],
            out_specs=pl.BlockSpec((block_b, T, Hp), lambda b, k: (b, 0, 0)),
            scratch_shapes=[
                pltpu.VMEM((block_b, T, Hp), jnp.bfloat16),   # scaled Q
                pltpu.VMEM((block_b, T, 1), jnp.float32),     # running max
                pltpu.VMEM((block_b, T, 1), jnp.float32),     # running denom
                pltpu.VMEM((block_b, T, Hp), jnp.float32),    # output accumulator
            ],
        ),
        compiler_params=pltpu.CompilerParams(
            dimension_semantics=("parallel", "arbitrary"),
            vmem_limit_bytes=vmem_limit),
    )(x, x, w_q, b_q, w_kv, b_kv)

    return out_padded[:, :, :H]


def reference(x, wk, wq, wv, bk, bq, bv, head_size):
    k = x @ wk + bk
    q = x @ wq + bq
    v = x @ wv + bv
    s = (q @ jnp.swapaxes(k, -1, -2)) / math.sqrt(head_size)
    T = x.shape[1]
    mask = jnp.tril(jnp.ones((T, T), dtype=bool))
    s = jnp.where(mask, s, -jnp.inf)
    p = jax.nn.softmax(s, axis=-1)
    return p @ v


if __name__ == "__main__":
    # Module hyperparameters (small, consistent with the forward pass).
    B, T = 2, 8
    embeddings_size = 32     # C
    context_size = T
    head_size = 16           # H
    # bias=True, dropout=0.0 (identity), is_decoder=True

    key = jax.random.PRNGKey(0)
    kx, k1, k2, k3, k4, k5, k6 = jax.random.split(key, 7)

    x = jax.random.normal(kx, (B, T, embeddings_size), dtype=jnp.float32)

    # Deterministic parameter init (uniform, like nn.Linear's default range).
    bound = 1.0 / math.sqrt(embeddings_size)
    init_w = lambda k: jax.random.uniform(
        k, (embeddings_size, head_size), jnp.float32, -bound, bound)
    init_b = lambda k: jax.random.uniform(
        k, (1, head_size), jnp.float32, -bound, bound)
    wk, wq, wv = init_w(k1), init_w(k2), init_w(k3)
    bk, bq, bv = init_b(k4), init_b(k5), init_b(k6)

    out = self_attention_head(x, wk, wq, wv, bk, bq, bv, head_size=head_size)
    out = jax.block_until_ready(out)

    ref = reference(x, wk, wq, wv, bk, bq, bv, head_size)
    assert out.shape == (B, T, head_size)
    # bf16 MXU operands (projection + attention) + approx reciprocal softmax.
    assert jnp.allclose(out, ref, atol=2.5e-2, rtol=2.5e-2)

    print("KERNEL_OK")
</pallas_src>

<mosaic_0001>
module attributes {stable_mosaic.version = 11 : i64} {
  func.func @_flash_head_kernel(%arg0: i32, %arg1: i32, %arg2: memref<2x8x32xf32, #tpu.memory_space<vmem>>, %arg3: memref<2x8x32xf32, #tpu.memory_space<vmem>>, %arg4: memref<32x128xbf16, #tpu.memory_space<vmem>>, %arg5: memref<1x128xf32, #tpu.memory_space<vmem>>, %arg6: memref<32x256xbf16, #tpu.memory_space<vmem>>, %arg7: memref<1x256xf32, #tpu.memory_space<vmem>>, %arg8: memref<2x8x128xf32, #tpu.memory_space<vmem>>, %arg9: memref<2x8x128xbf16, #tpu.memory_space<vmem>>, %arg10: memref<2x8x1xf32, #tpu.memory_space<vmem>>, %arg11: memref<2x8x1xf32, #tpu.memory_space<vmem>>, %arg12: memref<2x8x128xf32, #tpu.memory_space<vmem>>) attributes {dimension_semantics = [#tpu.dimension_semantics<parallel>, #tpu.dimension_semantics<arbitrary>], iteration_bounds = array<i64: 1, 1>, scalar_prefetch = 0 : i64, scratch_operands = 4 : i64, tpu.core_type = #tpu.core_type<tc>, window_params = [{transform_indices = @transform_0, window_bounds = array<i64: 2, 8, 32>}, {transform_indices = @transform_1, window_bounds = array<i64: 2, 8, 32>}, {pipeline_mode = #tpu.pipeline_mode<synchronous>, transform_indices = @transform_2, window_bounds = array<i64: 32, 128>}, {pipeline_mode = #tpu.pipeline_mode<synchronous>, transform_indices = @transform_3, window_bounds = array<i64: 1, 128>}, {pipeline_mode = #tpu.pipeline_mode<synchronous>, transform_indices = @transform_4, window_bounds = array<i64: 32, 256>}, {pipeline_mode = #tpu.pipeline_mode<synchronous>, transform_indices = @transform_5, window_bounds = array<i64: 1, 256>}, {transform_indices = @transform_6, window_bounds = array<i64: 2, 8, 128>}]} {
    %c0_i32 = arith.constant 0 : i32
    %0 = arith.cmpi eq, %arg1, %c0_i32 : i32
    %1 = arith.extui %0 : i1 to i32
    %c0_i32_0 = arith.constant 0 : i32
    %2 = arith.cmpi ne, %1, %c0_i32_0 : i32
    scf.if %2 {
      %c0_38 = arith.constant 0 : index
      %c0_39 = arith.constant 0 : index
      %c0_40 = arith.constant 0 : index
      %56 = vector.load %arg2[%c0_38, %c0_39, %c0_40] : memref<2x8x32xf32, #tpu.memory_space<vmem>>, vector<2x8x32xf32>
      %57 = arith.truncf %56 : vector<2x8x32xf32> to vector<2x8x32xbf16>
      %58 = vector.shape_cast %57 : vector<2x8x32xbf16> to vector<16x32xbf16>
      %c0_41 = arith.constant 0 : index
      %c0_42 = arith.constant 0 : index
      %59 = vector.load %arg4[%c0_41, %c0_42] : memref<32x128xbf16, #tpu.memory_space<vmem>>, vector<32x128xbf16>
      %cst_43 = arith.constant dense<0.000000e+00> : vector<16x128xf32>
      %60 = tpu.matmul %58, %59, %cst_43 {dimension_numbers = #tpu.dot_dimension_numbers<[1], [0], [0], [1], [0, 0, 1, 1], [], []>} : vector<16x32xbf16>, vector<32x128xbf16>, vector<16x128xf32> -> vector<16x128xf32>
      %c0_44 = arith.constant 0 : index
      %c0_45 = arith.constant 0 : index
      %61 = vector.load %arg5[%c0_44, %c0_45] : memref<1x128xf32, #tpu.memory_space<vmem>>, vector<1x128xf32>
      %62 = vector.broadcast %61 : vector<1x128xf32> to vector<16x128xf32>
      %63 = arith.addf %60, %62 : vector<16x128xf32>
      %cst_46 = arith.constant 2.500000e-01 : f32
      %64 = vector.broadcast %cst_46 : f32 to vector<16x128xf32>
      %65 = arith.mulf %63, %64 : vector<16x128xf32>
      %66 = arith.truncf %65 : vector<16x128xf32> to vector<16x128xbf16>
      %67 = vector.shape_cast %66 : vector<16x128xbf16> to vector<2x8x128xbf16>
      %c0_47 = arith.constant 0 : index
      %c0_48 = arith.constant 0 : index
      %c0_49 = arith.constant 0 : index
      %68 = vector.load %arg9[%c0_47, %c0_48, %c0_49] : memref<2x8x128xbf16, #tpu.memory_space<vmem>>, vector<2x8x128xbf16>
      tpu.vector_store %arg9[%c0_47, %c0_48, %c0_49], %67 {strides = array<i32>} : memref<2x8x128xbf16, #tpu.memory_space<vmem>>, vector<2x8x128xbf16>,
      %cst_50 = arith.constant -1.000000e+30 : f32
      %69 = vector.broadcast %cst_50 : f32 to vector<2x8x1xf32>
      %c0_51 = arith.constant 0 : index
      %c0_52 = arith.constant 0 : index
      %c0_53 = arith.constant 0 : index
      %70 = vector.load %arg10[%c0_51, %c0_52, %c0_53] : memref<2x8x1xf32, #tpu.memory_space<vmem>>, vector<2x8x1xf32>
      tpu.vector_store %arg10[%c0_51, %c0_52, %c0_53], %69 {strides = array<i32>} : memref<2x8x1xf32, #tpu.memory_space<vmem>>, vector<2x8x1xf32>,
      %cst_54 = arith.constant 0.000000e+00 : f32
      %71 = vector.broadcast %cst_54 : f32 to vector<2x8x1xf32>
      %c0_55 = arith.constant 0 : index
      %c0_56 = arith.constant 0 : index
      %c0_57 = arith.constant 0 : index
      %72 = vector.load %arg11[%c0_55, %c0_56, %c0_57] : memref<2x8x1xf32, #tpu.memory_space<vmem>>, vector<2x8x1xf32>
      tpu.vector_store %arg11[%c0_55, %c0_56, %c0_57], %71 {strides = array<i32>} : memref<2x8x1xf32, #tpu.memory_space<vmem>>, vector<2x8x1xf32>,
      %cst_58 = arith.constant 0.000000e+00 : f32
      %73 = vector.broadcast %cst_58 : f32 to vector<2x8x128xf32>
      %c0_59 = arith.constant 0 : index
      %c0_60 = arith.constant 0 : index
      %c0_61 = arith.constant 0 : index
      %74 = vector.load %arg12[%c0_59, %c0_60, %c0_61] : memref<2x8x128xf32, #tpu.memory_space<vmem>>, vector<2x8x128xf32>
      tpu.vector_store %arg12[%c0_59, %c0_60, %c0_61], %73 {strides = array<i32>} : memref<2x8x128xf32, #tpu.memory_space<vmem>>, vector<2x8x128xf32>,
    } else {
    }
    %c0 = arith.constant 0 : index
    %c0_1 = arith.constant 0 : index
    %c0_2 = arith.constant 0 : index
    %3 = vector.load %arg3[%c0, %c0_1, %c0_2] : memref<2x8x32xf32, #tpu.memory_space<vmem>>, vector<2x8x32xf32>
    %4 = arith.truncf %3 : vector<2x8x32xf32> to vector<2x8x32xbf16>
    %5 = vector.shape_cast %4 : vector<2x8x32xbf16> to vector<16x32xbf16>
    %c0_3 = arith.constant 0 : index
    %c0_4 = arith.constant 0 : index
    %6 = vector.load %arg6[%c0_3, %c0_4] : memref<32x256xbf16, #tpu.memory_space<vmem>>, vector<32x256xbf16>
    %cst = arith.constant dense<0.000000e+00> : vector<16x256xf32>
    %7 = tpu.matmul %5, %6, %cst {dimension_numbers = #tpu.dot_dimension_numbers<[1], [0], [0], [1], [0, 0, 1, 1], [], []>} : vector<16x32xbf16>, vector<32x256xbf16>, vector<16x256xf32> -> vector<16x256xf32>
    %c0_5 = arith.constant 0 : index
    %c0_6 = arith.constant 0 : index
    %8 = vector.load %arg7[%c0_5, %c0_6] : memref<1x256xf32, #tpu.memory_space<vmem>>, vector<1x256xf32>
    %9 = vector.broadcast %8 : vector<1x256xf32> to vector<16x256xf32>
    %10 = arith.addf %7, %9 : vector<16x256xf32>
    %11 = vector.shape_cast %10 : vector<16x256xf32> to vector<2x8x256xf32>
    %12 = vector.extract_strided_slice %11 {offsets = [0, 0, 0], sizes = [2, 8, 128], strides = [1, 1, 1]} : vector<2x8x256xf32> to vector<2x8x128xf32>
    %13 = arith.truncf %12 : vector<2x8x128xf32> to vector<2x8x128xbf16>
    %14 = vector.extract_strided_slice %11 {offsets = [0, 0, 128], sizes = [2, 8, 128], strides = [1, 1, 1]} : vector<2x8x256xf32> to vector<2x8x128xf32>
    %15 = arith.truncf %14 : vector<2x8x128xf32> to vector<2x8x128xbf16>
    %c0_7 = arith.constant 0 : index
    %c0_8 = arith.constant 0 : index
    %c0_9 = arith.constant 0 : index
    %16 = vector.load %arg9[%c0_7, %c0_8, %c0_9] : memref<2x8x128xbf16, #tpu.memory_space<vmem>>, vector<2x8x128xbf16>
    %cst_10 = arith.constant dense<0.000000e+00> : vector<2x8x8xf32>
    %17 = tpu.matmul %16, %13, %cst_10 {dimension_numbers = #tpu.dot_dimension_numbers<[2], [2], [1], [1], [0, 0, 0, 1, 1, 1], [0], [0]>} : vector<2x8x128xbf16>, vector<2x8x128xbf16>, vector<2x8x8xf32> -> vector<2x8x8xf32>
    %18 = tpu.iota {dimensions = array<i32: 0>} : vector<8x8xi32>
    %19 = tpu.iota {dimensions = array<i32: 1>} : vector<8x8xi32>
    %c8_i32 = arith.constant 8 : i32
    %20 = arith.muli %arg1, %c8_i32 : i32
    %21 = vector.broadcast %20 : i32 to vector<8x8xi32>
    %22 = arith.addi %19, %21 : vector<8x8xi32>
    %23 = arith.cmpi sle, %22, %18 : vector<8x8xi32>
    %24 = vector.shape_cast %23 : vector<8x8xi1> to vector<1x8x8xi1>
    %cst_11 = arith.constant -1.000000e+30 : f32
    %25 = vector.shape_cast %24 : vector<1x8x8xi1> to vector<1x8x8xi1>
    %26 = vector.broadcast %25 : vector<1x8x8xi1> to vector<2x8x8xi1>
    %27 = vector.broadcast %cst_11 : f32 to vector<2x8x8xf32>
    %28 = arith.select %26, %17, %27 : vector<2x8x8xi1>, vector<2x8x8xf32>
    %c0_12 = arith.constant 0 : index
    %c0_13 = arith.constant 0 : index
    %c0_14 = arith.constant 0 : index
    %29 = vector.load %arg10[%c0_12, %c0_13, %c0_14] : memref<2x8x1xf32, #tpu.memory_space<vmem>>, vector<2x8x1xf32>
    %cst_15 = arith.constant dense<0xFF800000> : vector<2x8xf32>
    %30 = vector.multi_reduction <maximumf>, %28, %cst_15 [2] : vector<2x8x8xf32> to vector<2x8xf32>
    %31 = vector.shape_cast %30 : vector<2x8xf32> to vector<2x8x1xf32>
    %32 = arith.maximumf %29, %31 : vector<2x8x1xf32>
    %c0_16 = arith.constant 0 : index
    %c0_17 = arith.constant 0 : index
    %c0_18 = arith.constant 0 : index
    %33 = vector.load %arg10[%c0_16, %c0_17, %c0_18] : memref<2x8x1xf32, #tpu.memory_space<vmem>>, vector<2x8x1xf32>
    %34 = arith.subf %33, %32 : vector<2x8x1xf32>
    %35 = math.exp %34 : vector<2x8x1xf32>
    %36 = vector.broadcast %32 : vector<2x8x1xf32> to vector<2x8x8xf32>
    %37 = arith.subf %28, %36 : vector<2x8x8xf32>
    %38 = math.exp %37 : vector<2x8x8xf32>
    %c0_19 = arith.constant 0 : index
    %c0_20 = arith.constant 0 : index
    %c0_21 = arith.constant 0 : index
    %39 = vector.load %arg11[%c0_19, %c0_20, %c0_21] : memref<2x8x1xf32, #tpu.memory_space<vmem>>, vector<2x8x1xf32>
    %40 = arith.mulf %35, %39 : vector<2x8x1xf32>
    %cst_22 = arith.constant dense<0.000000e+00> : vector<2x8xf32>
    %41 = vector.multi_reduction <add>, %38, %cst_22 [2] : vector<2x8x8xf32> to vector<2x8xf32>
    %42 = vector.shape_cast %41 : vector<2x8xf32> to vector<2x8x1xf32>
    %43 = arith.addf %40, %42 : vector<2x8x1xf32>
    %c0_23 = arith.constant 0 : index
    %c0_24 = arith.constant 0 : index
    %c0_25 = arith.constant 0 : index
    %44 = vector.load %arg11[%c0_23, %c0_24, %c0_25] : memref<2x8x1xf32, #tpu.memory_space<vmem>>, vector<2x8x1xf32>
    tpu.vector_store %arg11[%c0_23, %c0_24, %c0_25], %43 {strides = array<i32>} : memref<2x8x1xf32, #tpu.memory_space<vmem>>, vector<2x8x1xf32>,
    %c0_26 = arith.constant 0 : index
    %c0_27 = arith.constant 0 : index
    %c0_28 = arith.constant 0 : index
    %45 = vector.load %arg12[%c0_26, %c0_27, %c0_28] : memref<2x8x128xf32, #tpu.memory_space<vmem>>, vector<2x8x128xf32>
    %46 = vector.broadcast %35 : vector<2x8x1xf32> to vector<2x8x128xf32>
    %47 = arith.mulf %46, %45 : vector<2x8x128xf32>
    %48 = arith.truncf %38 : vector<2x8x8xf32> to vector<2x8x8xbf16>
    %cst_29 = arith.constant dense<0.000000e+00> : vector<2x8x128xf32>
    %49 = tpu.matmul %48, %15, %cst_29 {dimension_numbers = #tpu.dot_dimension_numbers<[2], [1], [1], [2], [0, 0, 0, 1, 1, 2], [0], [0]>} : vector<2x8x8xbf16>, vector<2x8x128xbf16>, vector<2x8x128xf32> -> vector<2x8x128xf32>
    %50 = arith.addf %47, %49 : vector<2x8x128xf32>
    %c0_30 = arith.constant 0 : index
    %c0_31 = arith.constant 0 : index
    %c0_32 = arith.constant 0 : index
    %51 = vector.load %arg12[%c0_30, %c0_31, %c0_32] : memref<2x8x128xf32, #tpu.memory_space<vmem>>, vector<2x8x128xf32>
    tpu.vector_store %arg12[%c0_30, %c0_31, %c0_32], %50 {strides = array<i32>} : memref<2x8x128xf32, #tpu.memory_space<vmem>>, vector<2x8x128xf32>,
    %c0_33 = arith.constant 0 : index
    %c0_34 = arith.constant 0 : index
    %c0_35 = arith.constant 0 : index
    %52 = vector.load %arg10[%c0_33, %c0_34, %c0_35] : memref<2x8x1xf32, #tpu.memory_space<vmem>>, vector<2x8x1xf32>
    tpu.vector_store %arg10[%c0_33, %c0_34, %c0_35], %32 {strides = array<i32>} : memref<2x8x1xf32, #tpu.memory_space<vmem>>, vector<2x8x1xf32>,
    %c0_i32_36 = arith.constant 0 : i32
    %53 = arith.cmpi eq, %arg1, %c0_i32_36 : i32
    %54 = arith.extui %53 : i1 to i32
    %c0_i32_37 = arith.constant 0 : i32
    %55 = arith.cmpi ne, %54, %c0_i32_37 : i32
    scf.if %55 {
      %c0_38 = arith.constant 0 : index
      %c0_39 = arith.constant 0 : index
      %c0_40 = arith.constant 0 : index
      %56 = vector.load %arg12[%c0_38, %c0_39, %c0_40] : memref<2x8x128xf32, #tpu.memory_space<vmem>>, vector<2x8x128xf32>
      %c0_41 = arith.constant 0 : index
      %c0_42 = arith.constant 0 : index
      %c0_43 = arith.constant 0 : index
      %57 = vector.load %arg11[%c0_41, %c0_42, %c0_43] : memref<2x8x1xf32, #tpu.memory_space<vmem>>, vector<2x8x1xf32>
      %58 = tpu.reciprocal %57 {approx = true} : vector<2x8x1xf32> -> vector<2x8x1xf32>
      %59 = vector.broadcast %58 : vector<2x8x1xf32> to vector<2x8x128xf32>
      %60 = arith.mulf %56, %59 : vector<2x8x128xf32>
      %c0_44 = arith.constant 0 : index
      %c0_45 = arith.constant 0 : index
      %c0_46 = arith.constant 0 : index
      %61 = vector.load %arg8[%c0_44, %c0_45, %c0_46] : memref<2x8x128xf32, #tpu.memory_space<vmem>>, vector<2x8x128xf32>
      tpu.vector_store %arg8[%c0_44, %c0_45, %c0_46], %60 {strides = array<i32>} : memref<2x8x128xf32, #tpu.memory_space<vmem>>, vector<2x8x128xf32>,
    } else {
    }
    return
  }
  func.func @transform_0(%arg0: i32, %arg1: i32) -> (i32, i32, i32) {
    %c0_i32 = arith.constant 0 : i32
    %c0_i32_0 = arith.constant 0 : i32
    %c0_i32_1 = arith.constant 0 : i32
    return %arg0, %c0_i32, %c0_i32_0 : i32, i32, i32
  }
  func.func @transform_1(%arg0: i32, %arg1: i32) -> (i32, i32, i32) {
    %c0_i32 = arith.constant 0 : i32
    %c0_i32_0 = arith.constant 0 : i32
    return %arg0, %arg1, %c0_i32 : i32, i32, i32
  }
  func.func @transform_2(%arg0: i32, %arg1: i32) -> (i32, i32) {
    %c0_i32 = arith.constant 0 : i32
    %c0_i32_0 = arith.constant 0 : i32
    %c0_i32_1 = arith.constant 0 : i32
    return %c0_i32, %c0_i32_0 : i32, i32
  }
  func.func @transform_3(%arg0: i32, %arg1: i32) -> (i32, i32) {
    %c0_i32 = arith.constant 0 : i32
    %c0_i32_0 = arith.constant 0 : i32
    %c0_i32_1 = arith.constant 0 : i32
    return %c0_i32, %c0_i32_0 : i32, i32
  }
  func.func @transform_4(%arg0: i32, %arg1: i32) -> (i32, i32) {
    %c0_i32 = arith.constant 0 : i32
    %c0_i32_0 = arith.constant 0 : i32
    %c0_i32_1 = arith.constant 0 : i32
    return %c0_i32, %c0_i32_0 : i32, i32
  }
  func.func @transform_5(%arg0: i32, %arg1: i32) -> (i32, i32) {
    %c0_i32 = arith.constant 0 : i32
    %c0_i32_0 = arith.constant 0 : i32
    %c0_i32_1 = arith.constant 0 : i32
    return %c0_i32, %c0_i32_0 : i32, i32
  }
  func.func @transform_6(%arg0: i32, %arg1: i32) -> (i32, i32, i32) {
    %c0_i32 = arith.constant 0 : i32
    %c0_i32_0 = arith.constant 0 : i32
    %c0_i32_1 = arith.constant 0 : i32
    return %arg0, %c0_i32, %c0_i32_0 : i32, i32, i32
  }
}

</mosaic_0001>

<bundles_post_ra>
// kernel: tpu_custom_call.1
= control target key start
LH: loop header
LB: loop body
LE: loop exit
PB: predicated region body
PF: predicated region fallthrough
CT: control target
= control target key end

     0   :  { %11 = vsyncpa [#allocation7], 0  ;;  %s960_s0 = inlined_call_operand.hbm [shape: f32[2,8,32], index: 0, kind: input, shape index: {}]   ;;  %s961_s1 = inlined_call_operand.hbm [shape: f32[2,8,32], index: 1, kind: input, shape index: {}]   ;;  %s962_s2 = inlined_call_operand.hbm [shape: bf16[32,128], index: 2, kind: input, shape index: {}]   ;;  %s963_s3 = inlined_call_operand.vmem [shape: f32[1,128], index: 3, kind: input, shape index: {}]   ;;  %s964_s4 = inlined_call_operand.hbm [shape: bf16[32,256], index: 4, kind: input, shape index: {}]   ;;  %s965_s5 = inlined_call_operand.vmem [shape: f32[1,256], index: 5, kind: input, shape index: {}]   ;;  %s966_s6 = inlined_call_operand.hbm [shape: f32[2,8,128], index: 6, kind: output, shape index: {}]  }
   0x1   :  { %12 = vsyncpa [#allocation10], 0 }
   0x2   :  { %13 = vsyncpa [#allocation13], 0 }
   0x3   :  { %14 = vsyncpa [#allocation8], 0  ;;  %s795_s21 = smov [#allocation9]   ;;  %s796_s23 = smov [#allocation6]  }
   0x4   :  { %s32_s22 = sshll.u32 %s795_s21, 4  ;;  %s20_s24 = sshll.u32 %s796_s23, 4  ;;  %s33_s22 = int_to_ptr.vmem [resolvable:$true] %s32_s22  ;;  %s843_s24 = int_to_ptr.vmem [resolvable:$true] %s20_s24 }
   0x5   :  { %s677_s27 = scalar_lea.hbm %s961_s1, 256 }
   0x6   :  { %p678_p0 = scmp.ne.s32.totalorder %s961_s1, %s677_s27  ;;  %p681_p1 = scmp.lt.u32.totalorder %s677_s27, %s961_s1 }
   0x8   :  { %p683_p2 = pnand %p681_p1, %p678_p0 }
   0xa   :  { %686 = shalt.err (!%p683_p2)
}
   0xb   :  { %s687_s8 = scalar_lea.vmem %s33_s22, 256  ;;  %p692_p4 = scmp.lt.s32.totalorder %s33_s22, %s33_s22 }
   0xc   :  { %p688_p3 = scmp.ne.s32.totalorder %s33_s22, %s687_s8  ;;  %p693_p5 = scmp.lt.s32.totalorder %s687_s8, %s687_s8 }
   0xe   :  { %p694_p6 = por %p693_p5, %p692_p4 }
  0x10   :  { %p695_p7 = pnand %p694_p6, %p688_p3 }
  0x12   :  { %698 = shalt.err (!%p695_p7)
}
  0x13   :  { %s797_s9 = smov 128   ;;  %s798_s10 = smov 8  }
  0x14   :  { %38 = dma.hbm_to_vmem [thread:$0]  %s961_s1, 256, %s33_s22, [#allocation10], %s797_s9, %s797_s9, %s798_s10  }
  0x15   :  { %s699_s15 = scalar_lea.hbm %s960_s0, 256 }
  0x16   :  { %p700_p8 = scmp.ne.s32.totalorder %s960_s0, %s699_s15  ;;  %p703_p9 = scmp.lt.u32.totalorder %s699_s15, %s960_s0 }
  0x18   :  { %p705_p10 = pnand %p703_p9, %p700_p8 }
  0x1a   :  { %708 = shalt.err (!%p705_p10)
}
  0x1b   :  { %s709_s20 = scalar_lea.vmem %s843_s24, 256  ;;  %p714_p12 = scmp.lt.s32.totalorder %s843_s24, %s843_s24 }
  0x1c   :  { %p710_p11 = scmp.ne.s32.totalorder %s843_s24, %s709_s20  ;;  %p715_p13 = scmp.lt.s32.totalorder %s709_s20, %s709_s20 }
  0x1e   :  { %p716_p0 = por %p715_p13, %p714_p12 }
  0x20   :  { %p717_p1 = pnand %p716_p0, %p710_p11 }
  0x22   :  { %720 = shalt.err (!%p717_p1)
}
  0x23   :  { %26 = dma.hbm_to_vmem [thread:$0]  %s960_s0, 256, %s843_s24, [#allocation7], %s797_s9, %s797_s9, %s798_s10  }
  0x24   :  { %s799_s22 = smov [#allocation11]   ;;  %s721_s27 = scalar_lea.hbm %s962_s2, 256 }
  0x25   :  { %s44_s23 = sshll.u32 %s799_s22, 4  ;;  %p722_p2 = scmp.ne.s32.totalorder %s962_s2, %s721_s27  ;;  %s45_s23 = int_to_ptr.vmem [resolvable:$true] %s44_s23 }
  0x26   :  { %p725_p3 = scmp.lt.u32.totalorder %s721_s27, %s962_s2 }
  0x28   :  { %p727_p4 = pnand %p725_p3, %p722_p2 }
  0x2a   :  { %730 = shalt.err (!%p727_p4)
}
  0x2b   :  { %s731_s8 = scalar_lea.vmem %s45_s23, 256  ;;  %p736_p6 = scmp.lt.s32.totalorder %s45_s23, %s45_s23 }
  0x2c   :  { %p732_p5 = scmp.ne.s32.totalorder %s45_s23, %s731_s8  ;;  %p737_p7 = scmp.lt.s32.totalorder %s731_s8, %s731_s8 }
  0x2e   :  { %p738_p8 = por %p737_p7, %p736_p6 }
  0x30   :  { %p739_p9 = pnand %p738_p8, %p732_p5 }
  0x32   :  { %742 = shalt.err (!%p739_p9)
}
  0x33   :  { %s800_s0 = smov 64   ;;  %s801_s24 = smov 4  }
  0x34   :  { %50 = dma.hbm_to_vmem [thread:$0]  %s962_s2, 256, %s45_s23, [#allocation10], %s800_s0, %s800_s0, %s801_s24  }
  0x35   :  { %s802_s13 = smov [#allocation12]   ;;  %s743_s17 = scalar_lea.hbm %s964_s4, 512 }
  0x36   :  { %s58_s14 = sshll.u32 %s802_s13, 4  ;;  %p744_p10 = scmp.ne.s32.totalorder %s964_s4, %s743_s17  ;;  %s59_s14 = int_to_ptr.vmem [resolvable:$true] %s58_s14 }
  0x37   :  { %p747_p11 = scmp.lt.u32.totalorder %s743_s17, %s964_s4 }
  0x39   :  { %p749_p12 = pnand %p747_p11, %p744_p10 }
  0x3b   :  { %752 = shalt.err (!%p749_p12)
}
  0x3c   :  { %s753_s21 = scalar_lea.vmem %s59_s14, 512  ;;  %p758_p0 = scmp.lt.s32.totalorder %s59_s14, %s59_s14 }
  0x3d   :  { %p754_p13 = scmp.ne.s32.totalorder %s59_s14, %s753_s21  ;;  %p759_p1 = scmp.lt.s32.totalorder %s753_s21, %s753_s21 }
  0x3f   :  { %p760_p2 = por %p759_p1, %p758_p0 }
  0x41   :  { %p761_p3 = pnand %p760_p2, %p754_p13 }
  0x43   :  { %764 = shalt.err (!%p761_p3)
}
  0x44   :  { %64 = dma.hbm_to_vmem [thread:$0]  %s964_s4, 512, %s59_s14, [#allocation13], %s797_s9, %s797_s9, %s798_s10  }
  0x45   :  { %787 = dma.done.wait [#allocation7], 256  }
  0x46   :  { %788 = vsyncadd [#allocation7], 4294967040 }
  0x47   :  { %789 = dma.done.wait [#allocation10], 512  }
  0x48   :  { %790 = vsyncadd [#allocation10], 4294966784 }
  0x49   :  { %791 = dma.done.wait [#allocation13], 512  }
  0x4a   :  { %792 = vsyncadd [#allocation13], 4294966784  ;;  %v803_v0 = vmov 0.0   ;;  %vm804_vm0 = vmmov 0   ;;  %v805_v1 = vmov 0   ;;  %v657_v2 = vld [vmem:[#allocation11] sm:$0xff]   ;;  %v190_v14 = vlaneseq }
  0x4b   :  { %610 = vmatprep.subr.bf16.mxu0 %v803_v0  ;;  %614 = vmatprep.mubr.msk.bf16.mxu0 %vm804_vm0, %v803_v0  ;;  %v658_v3 = vld [vmem:[#allocation12 + $0x4] ss:$8 sps:$4 sm:$0xff]   ;;  %v660_v4 = vld [vmem:[#allocation12] ss:$8 sps:$4 sm:$0xff]   ;;  %v661_v5 = vld [vmem:[#allocation11 + $0x8] sm:$0xff]   ;;  %vm116_vm1 = vcmask 261120  }
  0x4c   :  { %261 = vmatprep.mubr.bf16.mxu1 %v805_v1  ;;  %655 = vset.pattern.permute.xlu1 %v805_v1  ;;  %v662_v6 = vld [vmem:[#allocation12 + $0x14] ss:$8 sps:$4 sm:$0xff]   ;;  %v664_v7 = vld [vmem:[#allocation12 + $0x10] ss:$8 sps:$4 sm:$0xff]   ;;  %v180_v10 = vld [vmem:[#allocation9] sm:$0xff]  ;;  %v191_v15 = vshrl.u32 %v190_v14, 7 }
  0x4d   :  { %656 = vset.pattern.permute.xlu0 %v805_v1  ;;  %611 = vmatpush3.bf16.msra.mxu0 %v657_v2  ;;  %v84_v8 = vld [vmem:[#allocation6] sm:$0xff]  ;;  %v85_v9 = vld [vmem:[#allocation6 + $0x8] sm:$0xff]  ;;  %v181_v11 = vld [vmem:[#allocation9 + $0x8] sm:$0xff]  ;;  %vm437_vm2 = vcmask 1043456   ;;  %vm173_vm3 = vcmask 7168   ;;  %v361_v48 = vand.u32 127, %v190_v14 }
  0x4e   :  { %229 = vmatprep.subr.bf16.mxu1 %v658_v3  ;;  %612 = vmatprep.subr.bf16.mxu0 %v803_v0  ;;  %v590_v12 = vpack.c.bf16 %v85_v9, %v84_v8  ;;  %v593_v13 = vpack.c.bf16 %v181_v11, %v180_v10  ;;  %v192_v16 = vsub.s32 0, %v191_v15  ;;  %v188_v17 = vld [vmem:[%s965_s5] sm:$0x3]  ;;  %v196_v21 = vsub.s32 1, %v191_v15  ;;  %176 = vst.msk [vmem:[#allocation4] sm:$0xff] %vm173_vm3, %v803_v0 }
  0x4f   :  { %230 = vmatpush1.bf16.msra.mxu1 %v660_v4  ;;  %v575_v18 = vld [vmem:[%s963_s3] ss:$0 sm:$0xff]  ;;  %v806_v47 = vmov -1e+30   ;;  %177 = vst.msk [vmem:[#allocation4 + $0x8] sm:$0xff] %vm173_vm3, %v803_v0  ;;  %vm365_vm4 = vcmp.le.s32.totalorder %v361_v48, %v191_v15  ;;  %vm372_vm5 = vcmask 64512  }
  0x50   :  { %231 = vmatprep.subr.bf16.mxu1 %v662_v6  ;;  %v193_v19 = vrot.slane %v188_v17, %v192_v16  ;;  %v197_v30 = vrot.slane %v188_v17, %v196_v21  ;;  %174 = vst.msk [vmem:[#allocation3] sm:$0xff] %vm173_vm3, %v806_v47  ;;  %175 = vst.msk [vmem:[#allocation3 + $0x8] sm:$0xff] %vm173_vm3, %v806_v47  ;;  %s807_s3 = smov [#allocation14]  }
  0x51   :  { %613 = vmatpush3.bf16.msra.mxu0 %v661_v5  ;;  %s561_s5 = sshll.u32 %s807_s3, 4  ;;  %s562_s5 = int_to_ptr.vmem [resolvable:$true] %s561_s5 }
  0x52   :  { %618 = vmatprep.subr.bf16.mxu0 %v803_v0  ;;  %s765_s27 = scalar_lea.vmem %s562_s5, 256  ;;  %p770_p5 = scmp.lt.s32.totalorder %s562_s5, %s562_s5 }
  0x53   :  { %232 = vmatpush1.bf16.msra.mxu1 %v664_v7  ;;  %p766_p4 = scmp.ne.s32.totalorder %s562_s5, %s765_s27  ;;  %p771_p6 = scmp.lt.s32.totalorder %s765_s27, %s765_s27 }
  0x54   :  { %615 = vmatmul.mubr.msk.bf16.vlgmr.msra.gmra.mrb[0].mxu0 %vm116_vm1, %v590_v12  ;;  %624 = vmatprep.subr.bf16.mxu1 %v803_v0 }
  0x55   :  { %620 = vmatprep.mubr.msk.bf16.mxu0 %vm804_vm0, %v803_v0  ;;  %v403_v21 = vld [vmem:[#allocation4] sm:$0xff]  ;;  %p772_p7 = por %p771_p6, %p770_p5 }
  0x56   :  { %587 = vmatmul.mubr.msk.bf16.vlgmr.msra.gmra.mrb[0].mxu1 %vm116_vm1, %v593_v13 }
  0x57   :  { %626 = vmatprep.mubr.msk.bf16.mxu1 %vm804_vm0, %v803_v0  ;;  %v370_v61 = vld [vmem:[#allocation3] sm:$0xff]  ;;  %p773_p8 = pnand %p772_p7, %p766_p4 }
 0x127   :  { %v154_v20 = vpop.f32.mrb[0].mxu0 }
 0x128   :  { %v155_v22 = vadd.f32 %v575_v18, %v154_v20  ;;  %v616_v23 = vpop.f32.mrb[1].mxu0 }
 0x129   :  { %v263_v24 = vpop.f32.mrb[0].mxu1  ;;  %v157_v25 = vpop.f32.mrb[2].mxu0 }
 0x12a   :  { %v264_v26 = vadd.f32 %v263_v24, %v193_v19  ;;  %v158_v27 = vadd.f32 %v575_v18, %v157_v25  ;;  %v265_v28 = vpop.f32.mrb[1].mxu1  ;;  %v617_v29 = vpop.f32.mrb[3].mxu0  ;;  %v161_v32 = vmul.f32 0.25, %v155_v22  ;;  %v404_v24 = vld [vmem:[#allocation4 + $0x8] sm:$0xff] }
 0x12b   :  { %v267_v31 = vpop.f32.mrb[2].mxu1  ;;  %v266_v39 = vadd.f32 %v265_v28, %v197_v30 }
 0x12c   :  { %v272_v33 = vpack.c.bf16 %v264_v26, %v264_v26  ;;  %v162_v34 = vmul.f32 0.25, %v158_v27  ;;  %v268_v35 = vadd.f32 %v267_v31, %v193_v19  ;;  %v269_v36 = vpop.f32.mrb[3].mxu1 }
 0x12d   :  { %v270_v40 = vadd.f32 %v269_v36, %v197_v30  ;;  %v274_v41 = vpack.c.bf16 %v266_v39, %v266_v39 }
 0x12e   :  { %v597_v37 = vpack.c.bf16 %v162_v34, %v161_v32  ;;  %v273_v38 = vpack.c.bf16 %v268_v35, %v268_v35  ;;  %619 = vmatpush3.bf16.xpose.msra.mxu0 %v272_v33 }
 0x12f   :  { %630 = vmatprep.subr.bf16.mxu0 %v803_v0  ;;  %v275_v42 = vpack.c.bf16 %v270_v40, %v270_v40  ;;  %v439_v45 = vsel %vm437_vm2, %v274_v41, 0 }
 0x130   :  { %598 = vst [vmem:[#allocation2] sm:$0xff] %v597_v37   ;;  %625 = vmatpush3.bf16.xpose.msra.mxu1 %v273_v38 }
 0x131   :  { %636 = vmatprep.subr.bf16.mxu1 %v803_v0  ;;  %v485_v46 = vsel %vm437_vm2, %v275_v42, 0 }
 0x137   :  { %v276_v43 = vld [vmem:[#allocation2] sm:$0xf]  ;;  %v277_v44 = vld [vmem:[#allocation2 + $0x4] sm:$0xf] }
 0x138   :  { %621 = vmatmul.mubr.bf16.vlgmr.msra.gmra.mrb[4].mxu0 %v276_v43  ;;  %627 = vmatmul.mubr.bf16.vlgmr.msra.gmra.mrb[4].mxu1 %v277_v44 }
 0x139   :  { %631 = vmatpush3.bf16.msra.mxu0 %v439_v45  ;;  %637 = vmatpush3.bf16.msra.mxu1 %v485_v46 }
 0x13a   :  { %632 = vmatprep.mubr.msk.bf16.mxu0 %vm804_vm0, %v803_v0  ;;  %638 = vmatprep.mubr.msk.bf16.mxu1 %vm804_vm0, %v803_v0  ;;  %v371_v0 = vld [vmem:[#allocation3 + $0x8] sm:$0xff] }
 0x20b   :  { %v312_v49 = vpop.f32.mrb[4].mxu0  ;;  %v352_v50 = vpop.f32.mrb[4].mxu1 }
 0x20c   :  { %v368_v51 = vsel %vm365_vm4, %v312_v49, -1e+30  ;;  %v622_v52 = vpop.f32.mrb[5].mxu0  ;;  %v628_v53 = vpop.f32.mrb[5].mxu1  ;;  %v369_v57 = vsel %vm365_vm4, %v352_v50, -1e+30 }
 0x20d   :  { %v315_v54 = vpop.f32.mrb[6].mxu0  ;;  %v355_v55 = vpop.f32.mrb[6].mxu1  ;;  %v373_v56 = vsel %vm372_vm5, %v368_v51, -inf  ;;  %v376_v60 = vsel %vm372_vm5, %v369_v57, -inf }
 0x20e   :  { %v629_v58 = vpop.f32.mrb[7].mxu1  ;;  %374 = vmax.xlane.f32.xlu0 %v373_v56  ;;  %v623_v59 = vpop.f32.mrb[7].mxu0 }
 0x212   :  { %377 = vmax.xlane.f32.xlu0 %v376_v60 }
 0x29b   :  { %v375_v62 = vpop.xlane.xlu0 %374 }
 0x29c   :  { %v379_v63 = vmax.f32 %v370_v61, %v375_v62 }
 0x29e   :  { %v381_v1 = vsub.f32 %v370_v61, %v379_v63  ;;  %531 = vst.msk [vmem:[#allocation3] sm:$0xff] %vm173_vm3, %v379_v63  ;;  %389 = vperm.xlu1 %655, %v379_v63  }
 0x29f   :  { %v378_v2 = vpop.xlane.xlu0 %377 }
 0x2a0   :  { %v380_v3 = vmax.f32 %v371_v0, %v378_v2  ;;  %v383_v18 = vmul.f32 1.442695, %v381_v1 }
 0x2a2   :  { %v382_v4 = vsub.f32 %v371_v0, %v380_v3  ;;  %532 = vst.msk [vmem:[#allocation3 + $0x8] sm:$0xff] %vm173_vm3, %v380_v3  ;;  %394 = vperm.xlu1 %655, %v380_v3  }
 0x2a4   :  { %v385_v17 = vmul.f32 1.442695, %v382_v4 }
 0x31d   :  { %v390_v5 = vpop.permute.xlu1 %389 }
 0x31e   :  { %v397_v6 = vsub.f32 %v368_v51, %v390_v5 }
 0x320   :  { %v399_v7 = vmul.f32 1.442695, %v397_v6 }
 0x321   :  { %v395_v8 = vpop.permute.xlu1 %394 }
 0x322   :  { %665 = vpow2.f32 %v399_v7  ;;  %v398_v9 = vsub.f32 %v369_v57, %v395_v8 }
 0x324   :  { %v401_v10 = vmul.f32 1.442695, %v398_v9 }
 0x326   :  { %667 = vpow2.f32 %v401_v10 }
 0x327   :  { %669 = vpow2.f32 %v385_v17 }
 0x328   :  { %671 = vpow2.f32 %v383_v18 }
 0x32c   :  { %v666_v11 = vpop.eup %665 }
 0x32d   :  { %v407_v12 = vsel %vm372_vm5, %v666_v11, 0.0  ;;  %v432_v13 = vpack.c.bf16 %v666_v11, %v666_v11 }
 0x32e   :  { %408 = vadd.xlane.f32.xlu0 %v407_v12 }
 0x32f   :  { %633 = vmatmul.mubr.msk.bf16.vlgmr.msra.gmra.mrb[8].mxu0 %vm372_vm5, %v432_v13 }
 0x330   :  { %v668_v14 = vpop.eup %667 }
 0x331   :  { %v410_v15 = vsel %vm372_vm5, %v668_v14, 0.0  ;;  %v433_v16 = vpack.c.bf16 %v668_v14, %v668_v14  ;;  %v670_v19 = vpop.eup %669 }
 0x332   :  { %411 = vadd.xlane.f32.xlu1 %v410_v15  ;;  %v672_v20 = vpop.eup %671  ;;  %v406_v26 = vmul.f32 %v670_v19, %v404_v24 }
 0x333   :  { %639 = vmatmul.mubr.msk.bf16.vlgmr.msra.gmra.mrb[8].mxu1 %vm372_vm5, %v433_v16  ;;  %v405_v22 = vmul.f32 %v672_v20, %v403_v21 }
 0x343   :  { %427 = vperm.xlu1 %655, %v670_v19  }
 0x344   :  { %422 = vperm.xlu0 %656, %v672_v20  }
 0x3bb   :  { %v409_v23 = vpop.xlane.xlu0 %408 }
 0x3bc   :  { %v413_v25 = vadd.f32 %v409_v23, %v405_v22 }
 0x3be   :  { %416 = vst.msk [vmem:[#allocation4] sm:$0xff] %vm173_vm3, %v413_v25 }
 0x3bf   :  { %v412_v27 = vpop.xlane.xlu1 %411 }
 0x3c0   :  { %v414_v28 = vadd.f32 %v412_v27, %v406_v26 }
 0x3c2   :  { %417 = vst.msk [vmem:[#allocation4 + $0x8] sm:$0xff] %vm173_vm3, %v414_v28 }
 0x3c3   :  { %v423_v41 = vpop.permute.xlu0 %422  ;;  %v428_v43 = vpop.permute.xlu1 %427 }
 0x3c4   :  { %v430_v42 = vmul.f32 0.0, %v423_v41  ;;  %v431_v46 = vmul.f32 0.0, %v428_v43 }
 0x3c5   :  { %v538_v29 = vld [vmem:[#allocation4] sm:$0xff] }
 0x3c6   :  { %673 = vrcp.f32 %v538_v29 }
 0x3c9   :  { %v539_v30 = vld [vmem:[#allocation4 + $0x8] sm:$0xff] }
 0x3ca   :  { %675 = vrcp.f32 %v539_v30 }
 0x3d0   :  { %v674_v31 = vpop.eup %673 }
 0x3d1   :  { %544 = vperm.xlu0 %656, %v674_v31  }
 0x3d4   :  { %v676_v32 = vpop.eup %675 }
 0x3d5   :  { %549 = vperm.xlu0 %656, %v676_v32  }
 0x402   :  { %v475_v33 = vpop.f32.mrb[8].mxu0 }
 0x403   :  { %v634_v34 = vpop.f32.mrb[9].mxu0  ;;  %v527_v44 = vadd.f32 %v475_v33, %v430_v42 }
 0x404   :  { %v478_v35 = vpop.f32.mrb[10].mxu0 }
 0x405   :  { %v635_v36 = vpop.f32.mrb[11].mxu0 }
 0x406   :  { %v521_v37 = vpop.f32.mrb[8].mxu1 }
 0x407   :  { %v640_v38 = vpop.f32.mrb[9].mxu1  ;;  %v528_v48 = vadd.f32 %v521_v37, %v431_v46 }
 0x408   :  { %v524_v39 = vpop.f32.mrb[10].mxu1 }
 0x409   :  { %v641_v40 = vpop.f32.mrb[11].mxu1 }
 0x450   :  { %v545_v45 = vpop.permute.xlu0 %544 }
 0x451   :  { %v552_v47 = vmul.f32 %v545_v45, %v527_v44 }
 0x453   :  { %554 = vst [vmem:[#allocation14] sm:$0xff] %v552_v47 }
 0x454   :  { %v550_v49 = vpop.permute.xlu0 %549 }
 0x455   :  { %v553_v50 = vmul.f32 %v550_v49, %v528_v48 }
 0x457   :  { %555 = vst [vmem:[#allocation14 + $0x8] sm:$0xff] %v553_v50 }
 0x458   :  { %776 = shalt.err (!%p773_p8)
}
 0x459   :  { %s777_s30 = scalar_lea.hbm %s966_s6, 256 }
 0x45a   :  { %p778_p9 = scmp.ne.s32.totalorder %s966_s6, %s777_s30  ;;  %p781_p10 = scmp.lt.u32.totalorder %s777_s30, %s966_s6 }
 0x45c   :  { %p783_p11 = pnand %p781_p10, %p778_p9 }
 0x45e   :  { %786 = shalt.err (!%p783_p11)
}
 0x45f   :  { %567 = dma.vmem_to_hbm [thread:$0]  %s562_s5, 256, %s966_s6, [#allocation8], %s797_s9, %s797_s9, %s798_s10  }
 0x460   :  { %793 = dma.done.wait [#allocation8], 256  }
 0x461   :  { %794 = vsyncadd [#allocation8], 4294967040 }
 0x462   :  { %571 = vsyncpa [#allocation7], 1 }
 0x463   :  { %572 = vsyncpa [#allocation10], 1 }
 0x464   :  { %573 = vsyncpa [#allocation13], 1 }
 0x465   :  { %574 = vsyncpa [#allocation8], 1 }

</bundles_post_ra>
